<compile_context>
chip_gen: v7x
topology: tpu7x:2x2x1
jax: 0.10.0
libtpu: 0.0.40
codegen_flags: <defaults>
</compile_context>

<pallas_src>
import functools

import jax
import jax.numpy as jnp
from jax.experimental import pallas as pl
from jax.experimental.pallas import tpu as pltpu

HIDDEN = 512       # q_att_fc1 output width (fixed by the module)
N_GLIMPSE = 2      # q_att_fc2 output width (fixed by the module)
TB_CAP = 256       # batch rows per grid step (fits all gens' scoped VMEM)


def _round_up(x: int, m: int) -> int:
    return (x + m - 1) // m * m


def _choose_tb(B: int) -> int:
    """Batch rows per grid step.  Always a multiple of 8 (sublane tile)."""
    if B <= TB_CAP:
        return _round_up(B, 8)     # single grid step
    return TB_CAP                  # B is padded up to a multiple of TB_CAP


def qatt_kernel(qlens_ref, qr_ref, w1_ref, b1_ref, w2_ref, b2_ref, out_ref):
    """One grid step == one batch block of TB rows.

    qlens_ref : VMEM (TB, 1) int32          valid length per row
    qr_ref    : VMEM (TB, L, D)             f32 (or bf16 on the bf16 path)
    w1_ref    : VMEM (D, 512), b1 (1, 512)  biases stay f32
    w2_ref    : VMEM (512, 2), b2 (1, 2)
    out_ref   : VMEM (TB, 2*D) f32          lane-dense [glimpse0 | glimpse1]
    """
    TB, L, D = qr_ref.shape

    x3 = qr_ref[...]                               # (TB, L, D)
    # Free relayout when L is a multiple of the sublane tile (8); otherwise a
    # small VMEM copy (still cheap at these sizes).
    xf = x3.reshape(TB * L, D)

    # fc1 -> relu : single MXU push with M = TB*L rows
    h = jnp.dot(xf, w1_ref[...], preferred_element_type=jnp.float32) + b1_ref[...]
    h = jnp.maximum(h, 0.0)                        # (TB*L, 512) f32

    # fc2 -> per-position 2-way attention logits
    w2 = w2_ref[...]
    hm = h.astype(w2.dtype)                        # no-op on the f32 path
    logits = jnp.dot(hm, w2, preferred_element_type=jnp.float32) + b2_ref[...]
    logits3 = logits.reshape(TB, L, N_GLIMPSE)     # (TB, L, 2)

    # Validity mask: one vector compare against the (TB, 1) qlens block.
    lens = qlens_ref[...]                          # (TB, 1) int32
    pos = jax.lax.broadcasted_iota(jnp.int32, (TB, L, 1), 1)
    valid = pos < lens[:, :, None]                 # (TB, L, 1) bool

    # Max-stabilized masked softmax over the sequence axis (mathematically
    # identical to the module's exp/mask/normalize for qlens >= 1; qlens == 0
    # rows produce zeros instead of NaN).
    neg_big = jnp.float32(-1e30)
    zl = jnp.where(valid, logits3, neg_big)        # pad positions can't poison exp
    m = jnp.max(zl, axis=1, keepdims=True)         # (TB, 1, 2)
    e = jnp.exp(zl - m) * valid.astype(jnp.float32)
    s = jnp.sum(e, axis=1, keepdims=True)          # (TB, 1, 2)
    # approx=True would move this to the EUP (free slot) but adds ~1e-3-level
    # relative error; keep exact so the 1e-4 reference tolerance holds.
    att = e * pl.reciprocal(jnp.maximum(s, jnp.float32(1e-30)), approx=False)

    # Two attention-pooled glimpses -> one lane-dense (TB, 2*D) store.
    x3f = x3.astype(jnp.float32)
    g0 = jnp.sum(att[:, :, 0:1] * x3f, axis=1)     # (TB, D)
    g1 = jnp.sum(att[:, :, 1:2] * x3f, axis=1)     # (TB, D)
    out_ref[...] = jnp.concatenate([g0, g1], axis=-1)


@functools.partial(jax.jit, static_argnames=("use_bf16_mxu",))
def qatt_forward(qr, qlens, w1, b1, w2, b2, use_bf16_mxu: bool = False):
    B, L, D = qr.shape
    TB = _choose_tb(B)
    B_pad = _round_up(B, TB)
    grid = (B_pad // TB,)

    if use_bf16_mxu:
        # bf16 at the HBM boundary: halves qr's DMA bytes / VMEM buffers on
        # v6e/v7x.  Keep biases and accumulation in f32.  Avoid on v5e.
        qr_in = qr.astype(jnp.bfloat16)
        w1_in = w1.astype(jnp.bfloat16)
        w2_in = w2.astype(jnp.bfloat16)
    else:
        qr_in, w1_in, w2_in = qr, w1, w2

    if B_pad != B:
        qr_in = jnp.pad(qr_in, ((0, B_pad - B), (0, 0), (0, 0)))
        qlens = jnp.pad(qlens, ((0, B_pad - B),))   # padded rows -> length 0 -> zeros
    qlens2 = qlens.astype(jnp.int32).reshape(B_pad, 1)

    out = pl.pallas_call(
        qatt_kernel,
        out_shape=jax.ShapeDtypeStruct((B_pad, 2 * D), jnp.float32),
        grid_spec=pltpu.PrefetchScalarGridSpec(
            num_scalar_prefetch=0,
            grid=grid,
            in_specs=[
                pl.BlockSpec((TB, 1), lambda i: (i, 0)),               # qlens
                pl.BlockSpec((TB, L, D), lambda i: (i, 0, 0)),         # qr block
                pl.BlockSpec((D, HIDDEN), lambda i: (0, 0)),           # w1 (grid-invariant)
                pl.BlockSpec((1, HIDDEN), lambda i: (0, 0)),           # b1
                pl.BlockSpec((HIDDEN, N_GLIMPSE), lambda i: (0, 0)),   # w2
                pl.BlockSpec((1, N_GLIMPSE), lambda i: (0, 0)),        # b2
            ],
            out_specs=pl.BlockSpec((TB, 2 * D), lambda i: (i, 0)),     # lane-dense slab
        ),
        compiler_params=pltpu.CompilerParams(
            dimension_semantics=("parallel",),        # megacore sharding on v7x
            vmem_limit_bytes=32 * 1024 * 1024,        # headroom; <= every gen's cap
        ),
    )(qlens2, qr_in, w1_in, b1, w2_in, b2)

    return out[:B] if B_pad != B else out


def _reference(qr, qlens, w1, b1, w2, b2):
    """Pure-JAX mirror of the PyTorch forward (for a self-check; qlens >= 1)."""
    B, L, D = qr.shape
    x = qr.reshape(-1, D)
    h = jnp.maximum(x @ w1 + b1, 0.0)
    logits = (h @ w2 + b2).reshape(B, L, 2)
    mask = (jnp.arange(L)[None, :, None] < qlens[:, None, None]).astype(jnp.float32)
    e = jnp.exp(logits) * mask
    att = e / jnp.sum(e, axis=1, keepdims=True)
    return jnp.einsum("blg,bld->bgd", att, qr).reshape(B, 2 * D)


if __name__ == "__main__":
    # small shapes consistent with the module: batch=2, qr_len=8, qr_size=32
    B, L, D = 2, 8, 32
    key = jax.random.PRNGKey(0)
    k1, k2, k3, k4, k5 = jax.random.split(key, 5)

    qr = jax.random.normal(k1, (B, L, D), jnp.float32)
    qlens = jnp.array([5, 8], dtype=jnp.int32)          # valid lengths per batch

    # deterministic parameter init (Linear(qr_size,512), Linear(512,2))
    w1 = jax.random.normal(k2, (D, HIDDEN), jnp.float32) * 0.05
    b1 = jax.random.normal(k3, (1, HIDDEN), jnp.float32) * 0.05
    w2 = jax.random.normal(k4, (HIDDEN, 2), jnp.float32) * 0.05
    b2 = jax.random.normal(k5, (1, 2), jnp.float32) * 0.05

    out = qatt_forward(qr, qlens, w1, b1, w2, b2)
    jax.block_until_ready(out)

    expected = _reference(qr, qlens, w1, b1, w2, b2)
    assert out.shape == (B, 2 * D)
    assert jnp.allclose(out, expected, rtol=1e-4, atol=1e-4), "mismatch vs reference"
    print("KERNEL_OK")
</pallas_src>

<mosaic_0001>
module attributes {stable_mosaic.version = 11 : i64} {
  func.func @qatt_kernel(%arg0: i32, %arg1: memref<8x1xi32, #tpu.memory_space<vmem>>, %arg2: memref<8x8x32xf32, #tpu.memory_space<vmem>>, %arg3: memref<32x512xf32, #tpu.memory_space<vmem>>, %arg4: memref<1x512xf32, #tpu.memory_space<vmem>>, %arg5: memref<512x2xf32, #tpu.memory_space<vmem>>, %arg6: memref<1x2xf32, #tpu.memory_space<vmem>>, %arg7: memref<8x64xf32, #tpu.memory_space<vmem>>) attributes {dimension_semantics = [#tpu.dimension_semantics<parallel>], iteration_bounds = array<i64: 1>, scalar_prefetch = 0 : i64, scratch_operands = 0 : i64, tpu.core_type = #tpu.core_type<tc>, window_params = [{transform_indices = @transform_0, window_bounds = array<i64: 8, 1>}, {transform_indices = @transform_1, window_bounds = array<i64: 8, 8, 32>}, {pipeline_mode = #tpu.pipeline_mode<synchronous>, transform_indices = @transform_2, window_bounds = array<i64: 32, 512>}, {pipeline_mode = #tpu.pipeline_mode<synchronous>, transform_indices = @transform_3, window_bounds = array<i64: 1, 512>}, {pipeline_mode = #tpu.pipeline_mode<synchronous>, transform_indices = @transform_4, window_bounds = array<i64: 512, 2>}, {pipeline_mode = #tpu.pipeline_mode<synchronous>, transform_indices = @transform_5, window_bounds = array<i64: 1, 2>}, {transform_indices = @transform_6, window_bounds = array<i64: 8, 64>}]} {
    %c0 = arith.constant 0 : index
    %c0_0 = arith.constant 0 : index
    %c0_1 = arith.constant 0 : index
    %0 = vector.load %arg2[%c0, %c0_0, %c0_1] : memref<8x8x32xf32, #tpu.memory_space<vmem>>, vector<8x8x32xf32>
    %1 = vector.shape_cast %0 : vector<8x8x32xf32> to vector<64x32xf32>
    %c0_2 = arith.constant 0 : index
    %c0_3 = arith.constant 0 : index
    %2 = vector.load %arg3[%c0_2, %c0_3] : memref<32x512xf32, #tpu.memory_space<vmem>>, vector<32x512xf32>
    %cst = arith.constant dense<0.000000e+00> : vector<64x512xf32>
    %3 = tpu.matmul %1, %2, %cst {dimension_numbers = #tpu.dot_dimension_numbers<[1], [0], [0], [1], [0, 0, 1, 1], [], []>} : vector<64x32xf32>, vector<32x512xf32>, vector<64x512xf32> -> vector<64x512xf32>
    %c0_4 = arith.constant 0 : index
    %c0_5 = arith.constant 0 : index
    %4 = vector.load %arg4[%c0_4, %c0_5] : memref<1x512xf32, #tpu.memory_space<vmem>>, vector<1x512xf32>
    %5 = vector.broadcast %4 : vector<1x512xf32> to vector<64x512xf32>
    %6 = arith.addf %3, %5 : vector<64x512xf32>
    %cst_6 = arith.constant 0.000000e+00 : f32
    %7 = vector.broadcast %cst_6 : f32 to vector<64x512xf32>
    %8 = arith.maximumf %6, %7 : vector<64x512xf32>
    %c0_7 = arith.constant 0 : index
    %c0_8 = arith.constant 0 : index
    %9 = vector.load %arg5[%c0_7, %c0_8] : memref<512x2xf32, #tpu.memory_space<vmem>>, vector<512x2xf32>
    %cst_9 = arith.constant dense<0.000000e+00> : vector<64x2xf32>
    %10 = tpu.matmul %8, %9, %cst_9 {dimension_numbers = #tpu.dot_dimension_numbers<[1], [0], [0], [1], [0, 0, 1, 1], [], []>} : vector<64x512xf32>, vector<512x2xf32>, vector<64x2xf32> -> vector<64x2xf32>
    %c0_10 = arith.constant 0 : index
    %c0_11 = arith.constant 0 : index
    %11 = vector.load %arg6[%c0_10, %c0_11] : memref<1x2xf32, #tpu.memory_space<vmem>>, vector<1x2xf32>
    %12 = vector.broadcast %11 : vector<1x2xf32> to vector<64x2xf32>
    %13 = arith.addf %10, %12 : vector<64x2xf32>
    %14 = vector.shape_cast %13 : vector<64x2xf32> to vector<8x8x2xf32>
    %c0_12 = arith.constant 0 : index
    %c0_13 = arith.constant 0 : index
    %15 = vector.load %arg1[%c0_12, %c0_13] : memref<8x1xi32, #tpu.memory_space<vmem>>, vector<8x1xi32>
    %16 = tpu.iota {dimensions = array<i32: 1>} : vector<8x8x1xi32>
    %17 = vector.shape_cast %15 : vector<8x1xi32> to vector<8x1x1xi32>
    %18 = vector.broadcast %17 : vector<8x1x1xi32> to vector<8x8x1xi32>
    %19 = arith.cmpi slt, %16, %18 : vector<8x8x1xi32>
    %cst_14 = arith.constant -1.000000e+30 : f32
    %20 = vector.shape_cast %19 : vector<8x8x1xi1> to vector<8x8x1xi1>
    %21 = vector.broadcast %20 : vector<8x8x1xi1> to vector<8x8x2xi1>
    %22 = vector.broadcast %cst_14 : f32 to vector<8x8x2xf32>
    %23 = arith.select %21, %14, %22 : vector<8x8x2xi1>, vector<8x8x2xf32>
    %cst_15 = arith.constant dense<0xFF800000> : vector<8x2xf32>
    %24 = vector.multi_reduction <maximumf>, %23, %cst_15 [1] : vector<8x8x2xf32> to vector<8x2xf32>
    %25 = vector.shape_cast %24 : vector<8x2xf32> to vector<8x1x2xf32>
    %26 = vector.broadcast %25 : vector<8x1x2xf32> to vector<8x8x2xf32>
    %27 = arith.subf %23, %26 : vector<8x8x2xf32>
    %28 = math.exp %27 : vector<8x8x2xf32>
    %29 = arith.extui %19 : vector<8x8x1xi1> to vector<8x8x1xi32>
    %30 = arith.sitofp %29 : vector<8x8x1xi32> to vector<8x8x1xf32>
    %31 = vector.broadcast %30 : vector<8x8x1xf32> to vector<8x8x2xf32>
    %32 = arith.mulf %28, %31 : vector<8x8x2xf32>
    %cst_16 = arith.constant dense<0.000000e+00> : vector<8x2xf32>
    %33 = vector.multi_reduction <add>, %32, %cst_16 [1] : vector<8x8x2xf32> to vector<8x2xf32>
    %34 = vector.shape_cast %33 : vector<8x2xf32> to vector<8x1x2xf32>
    %cst_17 = arith.constant 1.000000e-30 : f32
    %35 = vector.broadcast %cst_17 : f32 to vector<8x1x2xf32>
    %36 = arith.maximumf %34, %35 : vector<8x1x2xf32>
    %37 = tpu.reciprocal %36 : vector<8x1x2xf32> -> vector<8x1x2xf32>
    %38 = vector.broadcast %37 : vector<8x1x2xf32> to vector<8x8x2xf32>
    %39 = arith.mulf %32, %38 : vector<8x8x2xf32>
    %40 = vector.extract_strided_slice %39 {offsets = [0, 0, 0], sizes = [8, 8, 1], strides = [1, 1, 1]} : vector<8x8x2xf32> to vector<8x8x1xf32>
    %41 = vector.broadcast %40 : vector<8x8x1xf32> to vector<8x8x32xf32>
    %42 = arith.mulf %41, %0 : vector<8x8x32xf32>
    %cst_18 = arith.constant dense<0.000000e+00> : vector<8x32xf32>
    %43 = vector.multi_reduction <add>, %42, %cst_18 [1] : vector<8x8x32xf32> to vector<8x32xf32>
    %44 = vector.extract_strided_slice %39 {offsets = [0, 0, 1], sizes = [8, 8, 1], strides = [1, 1, 1]} : vector<8x8x2xf32> to vector<8x8x1xf32>
    %45 = vector.broadcast %44 : vector<8x8x1xf32> to vector<8x8x32xf32>
    %46 = arith.mulf %45, %0 : vector<8x8x32xf32>
    %cst_19 = arith.constant dense<0.000000e+00> : vector<8x32xf32>
    %47 = vector.multi_reduction <add>, %46, %cst_19 [1] : vector<8x8x32xf32> to vector<8x32xf32>
    %48 = tpu.concatenate %43, %47 in 1 : vector<8x32xf32>, vector<8x32xf32> -> vector<8x64xf32>
    %c0_20 = arith.constant 0 : index
    %c0_21 = arith.constant 0 : index
    %49 = vector.load %arg7[%c0_20, %c0_21] : memref<8x64xf32, #tpu.memory_space<vmem>>, vector<8x64xf32>
    tpu.vector_store %arg7[%c0_20, %c0_21], %48 {strides = array<i32>} : memref<8x64xf32, #tpu.memory_space<vmem>>, vector<8x64xf32>,
    return
  }
  func.func @transform_0(%arg0: i32) -> (i32, i32) {
    %c0_i32 = arith.constant 0 : i32
    %c0_i32_0 = arith.constant 0 : i32
    return %arg0, %c0_i32 : i32, i32
  }
  func.func @transform_1(%arg0: i32) -> (i32, i32, i32) {
    %c0_i32 = arith.constant 0 : i32
    %c0_i32_0 = arith.constant 0 : i32
    %c0_i32_1 = arith.constant 0 : i32
    return %arg0, %c0_i32, %c0_i32_0 : i32, i32, i32
  }
  func.func @transform_2(%arg0: i32) -> (i32, i32) {
    %c0_i32 = arith.constant 0 : i32
    %c0_i32_0 = arith.constant 0 : i32
    %c0_i32_1 = arith.constant 0 : i32
    return %c0_i32, %c0_i32_0 : i32, i32
  }
  func.func @transform_3(%arg0: i32) -> (i32, i32) {
    %c0_i32 = arith.constant 0 : i32
    %c0_i32_0 = arith.constant 0 : i32
    %c0_i32_1 = arith.constant 0 : i32
    return %c0_i32, %c0_i32_0 : i32, i32
  }
  func.func @transform_4(%arg0: i32) -> (i32, i32) {
    %c0_i32 = arith.constant 0 : i32
    %c0_i32_0 = arith.constant 0 : i32
    %c0_i32_1 = arith.constant 0 : i32
    return %c0_i32, %c0_i32_0 : i32, i32
  }
  func.func @transform_5(%arg0: i32) -> (i32, i32) {
    %c0_i32 = arith.constant 0 : i32
    %c0_i32_0 = arith.constant 0 : i32
    %c0_i32_1 = arith.constant 0 : i32
    return %c0_i32, %c0_i32_0 : i32, i32
  }
  func.func @transform_6(%arg0: i32) -> (i32, i32) {
    %c0_i32 = arith.constant 0 : i32
    %c0_i32_0 = arith.constant 0 : i32
    return %arg0, %c0_i32 : i32, i32
  }
}

</mosaic_0001>

<bundles_post_ra>
// kernel: qatt_forward.1
= control target key start
LH: loop header
LB: loop body
LE: loop exit
PB: predicated region body
PF: predicated region fallthrough
CT: control target
= control target key end

     0   :  { %v1528_v3 = vmov 0.0   ;;  %vm69_vm0 = vcmask 261120   ;;  %vm773_vm10 = vcmask 15360   ;;  %s2180_s2 = inlined_call_operand.vmem [shape: f32[32,512], index: 2, kind: input, shape index: {}]   ;;  %s2181_s1 = inlined_call_operand.vmem [shape: f32[8,8,32], index: 1, kind: input, shape index: {}]   ;;  %s2182_s4 = inlined_call_operand.vmem [shape: f32[512,2], index: 4, kind: input, shape index: {}]   ;;  %s2183_s0 = inlined_call_operand.vmem [shape: s32[8,1], index: 0, kind: input, shape index: {}]   ;;  %s2184_s3 = inlined_call_operand.vmem [shape: f32[1,512], index: 3, kind: input, shape index: {}]   ;;  %s2185_s5 = inlined_call_operand.vmem [shape: f32[1,2], index: 5, kind: input, shape index: {}]   ;;  %s2186_s6 = inlined_call_operand.vmem [shape: f32[8,64], index: 6, kind: output, shape index: {}]  }
   0x1   :  { %v32_v0 = vld [vmem:[%s2180_s2 + $0x8] sm:$0xff]  ;;  %v34_v2 = vld [vmem:[%s2180_s2 + $0x18] sm:$0xff]  ;;  %158 = vmatprep.mubr.f32.mxu0 %v1528_v3  ;;  %271 = vmatprep.mubr.f32.mxu1 %v1528_v3  ;;  %v31_v6 = vld [vmem:[%s2180_s2] sm:$0xff] }
   0x2   :  { %v36_v1 = vld [vmem:[%s2180_s2 + $0x28] sm:$0xff]  ;;  %v38_v5 = vld [vmem:[%s2180_s2 + $0x38] sm:$0xff]  ;;  %v35_v7 = vld [vmem:[%s2180_s2 + $0x20] sm:$0xff] }
   0x3   :  { %v1375_v4 = vpack.c.bf16 %v36_v1, %v32_v0  ;;  %v1383_v8 = vpack.c.bf16 %v38_v5, %v34_v2  ;;  %v1377_v9 = vpack.c.bf16 %v35_v7, %v31_v6  ;;  %v33_v10 = vld [vmem:[%s2180_s2 + $0x10] sm:$0xff]  ;;  %v40_v12 = vld [vmem:[%s2180_s2 + $0x48] sm:$0xff]  ;;  %v42_v15 = vld [vmem:[%s2180_s2 + $0x58] sm:$0xff] }
   0x4   :  { %v37_v11 = vld [vmem:[%s2180_s2 + $0x30] sm:$0xff]  ;;  %v44_v14 = vld [vmem:[%s2180_s2 + $0x68] sm:$0xff]  ;;  %v46_v16 = vld [vmem:[%s2180_s2 + $0x78] sm:$0xff] }
   0x5   :  { %1376 = vmatprep.subr.bf16.mxu0 %v1375_v4  ;;  %v1385_v13 = vpack.c.bf16 %v37_v11, %v33_v10  ;;  %1384 = vmatprep.subr.bf16.mxu1 %v1383_v8  ;;  %v1379_v17 = vpack.c.bf16 %v44_v14, %v40_v12  ;;  %v1387_v18 = vpack.c.bf16 %v46_v16, %v42_v15  ;;  %v39_v19 = vld [vmem:[%s2180_s2 + $0x40] sm:$0xff]  ;;  %v41_v21 = vld [vmem:[%s2180_s2 + $0x50] sm:$0xff]  ;;  %v369_v27 = vld [vmem:[%s2182_s4 + $0x88] sm:$0xff] }
   0x6   :  { %1378 = vmatpush1.bf16.msra.mxu0 %v1377_v9  ;;  %v43_v20 = vld [vmem:[%s2180_s2 + $0x60] sm:$0xff]  ;;  %v45_v23 = vld [vmem:[%s2180_s2 + $0x70] sm:$0xff]  ;;  %v353_v30 = vld [vmem:[%s2182_s4 + $0x8] sm:$0xff] }
   0x7   :  { %1386 = vmatpush1.bf16.msra.mxu1 %v1385_v13  ;;  %v1381_v22 = vpack.c.bf16 %v43_v20, %v39_v19  ;;  %1380 = vmatprep.subr.bf16.mxu0 %v1379_v17  ;;  %v1389_v24 = vpack.c.bf16 %v45_v23, %v41_v21  ;;  %v23_v25 = vld [vmem:[%s2181_s1] sm:$0xff]  ;;  %v401_v32 = vld [vmem:[%s2182_s4 + $0x188] sm:$0xff]  ;;  %v370_v38 = vld [vmem:[%s2182_s4 + $0x90] sm:$0xff] }
   0x8   :  { %1388 = vmatprep.subr.bf16.mxu1 %v1387_v18  ;;  %v368_v26 = vld [vmem:[%s2182_s4 + $0x80] sm:$0xff]  ;;  %v24_v33 = vld [vmem:[%s2181_s1 + $0x8] sm:$0xff]  ;;  %v371_v40 = vld [vmem:[%s2182_s4 + $0x98] sm:$0xff] }
   0x9   :  { %v352_v28 = vld [vmem:[%s2182_s4] sm:$0xff]  ;;  %v1391_v29 = vpack.c.bf16 %v369_v27, %v368_v26  ;;  %v385_v37 = vld [vmem:[%s2182_s4 + $0x108] sm:$0xff]  ;;  %v354_v41 = vld [vmem:[%s2182_s4 + $0x10] sm:$0xff]  ;;  %v1395_v43 = vpack.c.bf16 %v371_v40, %v370_v38 }
   0xa   :  { %1382 = vmatpush1.bf16.msra.mxu0 %v1381_v22  ;;  %v400_v31 = vld [vmem:[%s2182_s4 + $0x180] sm:$0xff]  ;;  %v1393_v34 = vpack.c.bf16 %v353_v30, %v352_v28  ;;  %v355_v42 = vld [vmem:[%s2182_s4 + $0x18] sm:$0xff]  ;;  %v402_v44 = vld [vmem:[%s2182_s4 + $0x190] sm:$0xff] }
   0xb   :  { %1390 = vmatpush1.bf16.msra.mxu1 %v1389_v24  ;;  %v1423_v35 = vpack.c.bf16 %v401_v32, %v400_v31  ;;  %v384_v36 = vld [vmem:[%s2182_s4 + $0x100] sm:$0xff]  ;;  %1392 = vmatprep.subr.bf16.mxu0 %v1391_v29  ;;  %v403_v45 = vld [vmem:[%s2182_s4 + $0x198] sm:$0xff]  ;;  %v386_v46 = vld [vmem:[%s2182_s4 + $0x110] sm:$0xff]  ;;  %v1397_v47 = vpack.c.bf16 %v355_v42, %v354_v41 }
   0xc   :  { %v1425_v39 = vpack.c.bf16 %v385_v37, %v384_v36  ;;  %v387_v48 = vld [vmem:[%s2182_s4 + $0x118] sm:$0xff]  ;;  %v372_v49 = vld [vmem:[%s2182_s4 + $0xa0] sm:$0xff]  ;;  %v373_v50 = vld [vmem:[%s2182_s4 + $0xa8] sm:$0xff]  ;;  %v1427_v52 = vpack.c.bf16 %v403_v45, %v402_v44 }
   0xd   :  { %1238 = vmatmul.mubr.msk.f32.vlgmr.msra.gmra.mrb[0].mxu0 %vm69_vm0, %v23_v25  ;;  %v25_v51 = vld [vmem:[%s2181_s1 + $0x10] sm:$0xff]  ;;  %1424 = vmatprep.subr.bf16.mxu1 %v1423_v35  ;;  %v1399_v53 = vpack.c.bf16 %v373_v50, %v372_v49  ;;  %v356_v54 = vld [vmem:[%s2182_s4 + $0x20] sm:$0xff]  ;;  %v357_v55 = vld [vmem:[%s2182_s4 + $0x28] sm:$0xff]  ;;  %v1429_v56 = vpack.c.bf16 %v387_v48, %v386_v46 }
   0xe   :  { %1246 = vmatmul.mubr.msk.f32.vlgmr.msra.gmra.mrb[0].mxu1 %vm69_vm0, %v23_v25  ;;  %164 = vmatprep.mubr.f32.mxu0 %v1528_v3  ;;  %v404_v57 = vld [vmem:[%s2182_s4 + $0x1a0] sm:$0xff]  ;;  %v405_v58 = vld [vmem:[%s2182_s4 + $0x1a8] sm:$0xff]  ;;  %v374_v61 = vld [vmem:[%s2182_s4 + $0xb0] sm:$0xff]  ;;  %v1401_v63 = vpack.c.bf16 %v357_v55, %v356_v54 }
   0xf   :  { %277 = vmatprep.mubr.f32.mxu1 %v1528_v3  ;;  %1394 = vmatpush3.bf16.msra.mxu0 %v1393_v34  ;;  %v388_v59 = vld [vmem:[%s2182_s4 + $0x120] sm:$0xff]  ;;  %v389_v60 = vld [vmem:[%s2182_s4 + $0x128] sm:$0xff]  ;;  %v375_v62 = vld [vmem:[%s2182_s4 + $0xb8] sm:$0xff]  ;;  %v1431_v0 = vpack.c.bf16 %v405_v58, %v404_v57 }
  0x10   :  { %1396 = vmatprep.subr.bf16.mxu0 %v1395_v43  ;;  %1426 = vmatpush3.bf16.msra.mxu1 %v1425_v39  ;;  %v1403_v1 = vpack.c.bf16 %v375_v62, %v374_v61  ;;  %v358_v2 = vld [vmem:[%s2182_s4 + $0x30] sm:$0xff]  ;;  %v359_v4 = vld [vmem:[%s2182_s4 + $0x38] sm:$0xff]  ;;  %v1433_v6 = vpack.c.bf16 %v389_v60, %v388_v59  ;;  %v376_v8 = vld [vmem:[%s2182_s4 + $0xc0] sm:$0xff] }
  0x11   :  { %1239 = vmatmul.mubr.msk.f32.gmra.mrb[2].mxu0 %vm69_vm0, %v24_v33  ;;  %1428 = vmatprep.subr.bf16.mxu1 %v1427_v52  ;;  %v406_v5 = vld [vmem:[%s2182_s4 + $0x1b0] sm:$0xff]  ;;  %v407_v7 = vld [vmem:[%s2182_s4 + $0x1b8] sm:$0xff]  ;;  %v377_v9 = vld [vmem:[%s2182_s4 + $0xc8] sm:$0xff]  ;;  %v1405_v13 = vpack.c.bf16 %v359_v4, %v358_v2  ;;  %v49_v2 = vlaneseq  ;;  %v1529_v4 = vmov 0  }
  0x12   :  { %1247 = vmatmul.mubr.msk.f32.gmra.mrb[2].mxu1 %vm69_vm0, %v24_v33  ;;  %170 = vmatprep.mubr.f32.mxu0 %v1528_v3  ;;  %v26_v10 = vld [vmem:[%s2181_s1 + $0x18] sm:$0xff]  ;;  %v390_v11 = vld [vmem:[%s2182_s4 + $0x130] sm:$0xff]  ;;  %v1435_v14 = vpack.c.bf16 %v407_v7, %v406_v5  ;;  %v1407_v15 = vpack.c.bf16 %v377_v9, %v376_v8  ;;  %v360_v16 = vld [vmem:[%s2182_s4 + $0x40] sm:$0xff]  ;;  %v1530_v5 = vmov 1966171168  }
  0x13   :  { %283 = vmatprep.mubr.f32.mxu1 %v1528_v3  ;;  %1398 = vmatpush3.bf16.msra.mxu0 %v1397_v47  ;;  %v391_v12 = vld [vmem:[%s2182_s4 + $0x138] sm:$0xff]  ;;  %v361_v17 = vld [vmem:[%s2182_s4 + $0x48] sm:$0xff]  ;;  %v408_v18 = vld [vmem:[%s2182_s4 + $0x1c0] sm:$0xff]  ;;  %v1869_v8 = vshrl.u32 %v49_v2, 7 }
  0x14   :  { %1400 = vmatprep.subr.bf16.mxu0 %v1399_v53  ;;  %1430 = vmatpush3.bf16.msra.mxu1 %v1429_v56  ;;  %v1437_v19 = vpack.c.bf16 %v391_v12, %v390_v11  ;;  %v409_v20 = vld [vmem:[%s2182_s4 + $0x1c8] sm:$0xff]  ;;  %v378_v21 = vld [vmem:[%s2182_s4 + $0xd0] sm:$0xff]  ;;  %v379_v22 = vld [vmem:[%s2182_s4 + $0xd8] sm:$0xff]  ;;  %v1409_v26 = vpack.c.bf16 %v361_v17, %v360_v16 }
  0x15   :  { %1240 = vmatmul.mubr.msk.f32.gmra.mrb[4].mxu0 %vm69_vm0, %v25_v51  ;;  %1432 = vmatprep.subr.bf16.mxu1 %v1431_v0  ;;  %v27_v23 = vld [vmem:[%s2181_s1 + $0x20] sm:$0xff]  ;;  %v393_v25 = vld [vmem:[%s2182_s4 + $0x148] sm:$0xff]  ;;  %v1439_v27 = vpack.c.bf16 %v409_v20, %v408_v18  ;;  %v1411_v28 = vpack.c.bf16 %v379_v22, %v378_v21  ;;  %v362_v29 = vld [vmem:[%s2182_s4 + $0x50] sm:$0xff] }
  0x16   :  { %1248 = vmatmul.mubr.msk.f32.gmra.mrb[4].mxu1 %vm69_vm0, %v25_v51  ;;  %176 = vmatprep.mubr.f32.mxu0 %v1528_v3  ;;  %v392_v24 = vld [vmem:[%s2182_s4 + $0x140] sm:$0xff]  ;;  %v363_v30 = vld [vmem:[%s2182_s4 + $0x58] sm:$0xff]  ;;  %v410_v31 = vld [vmem:[%s2182_s4 + $0x1d0] sm:$0xff] }
  0x17   :  { %289 = vmatprep.mubr.f32.mxu1 %v1528_v3  ;;  %1402 = vmatpush3.bf16.msra.mxu0 %v1401_v63  ;;  %v1441_v32 = vpack.c.bf16 %v393_v25, %v392_v24  ;;  %v411_v33 = vld [vmem:[%s2182_s4 + $0x1d8] sm:$0xff]  ;;  %v380_v34 = vld [vmem:[%s2182_s4 + $0xe0] sm:$0xff]  ;;  %v381_v35 = vld [vmem:[%s2182_s4 + $0xe8] sm:$0xff]  ;;  %v1413_v39 = vpack.c.bf16 %v363_v30, %v362_v29 }
  0x18   :  { %1404 = vmatprep.subr.bf16.mxu0 %v1403_v1  ;;  %1434 = vmatpush3.bf16.msra.mxu1 %v1433_v6  ;;  %v28_v36 = vld [vmem:[%s2181_s1 + $0x28] sm:$0xff]  ;;  %v394_v37 = vld [vmem:[%s2182_s4 + $0x150] sm:$0xff]  ;;  %v395_v38 = vld [vmem:[%s2182_s4 + $0x158] sm:$0xff]  ;;  %v1443_v40 = vpack.c.bf16 %v411_v33, %v410_v31  ;;  %v1415_v41 = vpack.c.bf16 %v381_v35, %v380_v34  ;;  %v638_v6 = vunpack.c.l.s4 %v1530_v5 }
  0x19   :  { %1241 = vmatmul.mubr.msk.f32.gmra.mrb[6].mxu0 %vm69_vm0, %v26_v10  ;;  %1436 = vmatprep.subr.bf16.mxu1 %v1435_v14  ;;  %v364_v42 = vld [vmem:[%s2182_s4 + $0x60] sm:$0xff]  ;;  %v365_v43 = vld [vmem:[%s2182_s4 + $0x68] sm:$0xff]  ;;  %v1445_v44 = vpack.c.bf16 %v395_v38, %v394_v37  ;;  %v29_v47 = vld [vmem:[%s2181_s1 + $0x30] sm:$0xff]  ;;  %v1873_v14 = vsub.s32 0, %v1869_v8 }
  0x1a   :  { %1249 = vmatmul.mubr.msk.f32.gmra.mrb[6].mxu1 %vm69_vm0, %v26_v10  ;;  %182 = vmatprep.mubr.f32.mxu0 %v1528_v3  ;;  %v412_v45 = vld [vmem:[%s2182_s4 + $0x1e0] sm:$0xff]  ;;  %v413_v46 = vld [vmem:[%s2182_s4 + $0x1e8] sm:$0xff]  ;;  %v1417_v48 = vpack.c.bf16 %v365_v43, %v364_v42  ;;  %v30_v50 = vld [vmem:[%s2181_s1 + $0x38] sm:$0xff]  ;;  %v639_v9 = vunpack.c.0.s8 %v638_v6 }
  0x1b   :  { %295 = vmatprep.mubr.f32.mxu1 %v1528_v3  ;;  %1406 = vmatpush3.bf16.msra.mxu0 %v1405_v13  ;;  %v1447_v49 = vpack.c.bf16 %v413_v46, %v412_v45  ;;  %v396_v51 = vld [vmem:[%s2182_s4 + $0x160] sm:$0xff]  ;;  %v397_v52 = vld [vmem:[%s2182_s4 + $0x168] sm:$0xff]  ;;  %v382_v54 = vld [vmem:[%s2182_s4 + $0xf0] sm:$0xff] }
  0x1c   :  { %1408 = vmatprep.subr.bf16.mxu0 %v1407_v15  ;;  %1438 = vmatpush3.bf16.msra.mxu1 %v1437_v19  ;;  %v1449_v53 = vpack.c.bf16 %v397_v52, %v396_v51  ;;  %v383_v55 = vld [vmem:[%s2182_s4 + $0xf8] sm:$0xff]  ;;  %v414_v56 = vld [vmem:[%s2182_s4 + $0x1f0] sm:$0xff]  ;;  %v633_v7 = vld [vmem:[%s2183_s0] sm:$0xff]  ;;  %v642_v11 = vsub.s32 %v639_v9, %v1869_v8 }
  0x1d   :  { %1242 = vmatmul.mubr.msk.f32.gmra.mrb[8].mxu0 %vm69_vm0, %v27_v23  ;;  %1440 = vmatprep.subr.bf16.mxu1 %v1439_v27  ;;  %v1419_v57 = vpack.c.bf16 %v383_v55, %v382_v54  ;;  %v366_v58 = vld [vmem:[%s2182_s4 + $0x70] sm:$0xff]  ;;  %v367_v59 = vld [vmem:[%s2182_s4 + $0x78] sm:$0xff]  ;;  %v636_v10 = vcombine.high %v633_v7, %v633_v7 }
  0x1e   :  { %1250 = vmatmul.mubr.msk.f32.gmra.mrb[8].mxu1 %vm69_vm0, %v27_v23  ;;  %188 = vmatprep.mubr.f32.mxu0 %v1528_v3  ;;  %v415_v60 = vld [vmem:[%s2182_s4 + $0x1f8] sm:$0xff]  ;;  %v1421_v61 = vpack.c.bf16 %v367_v59, %v366_v58  ;;  %v398_v63 = vld [vmem:[%s2182_s4 + $0x170] sm:$0xff]  ;;  %v643_v12 = vrot.slane %v633_v7, %v642_v11  ;;  %v59_v58 = vsub.s32 2, %v1869_v8  ;;  %v55_v59 = vsub.s32 1, %v1869_v8 }
  0x1f   :  { %301 = vmatprep.mubr.f32.mxu1 %v1528_v3  ;;  %1410 = vmatpush3.bf16.msra.mxu0 %v1409_v26  ;;  %v1451_v62 = vpack.c.bf16 %v415_v60, %v414_v56  ;;  %v399_v0 = vld [vmem:[%s2182_s4 + $0x178] sm:$0xff]  ;;  %v650_v13 = vrot.slane %v636_v10, %v642_v11  ;;  %v63_v60 = vsub.s32 3, %v1869_v8 }
  0x20   :  { %1412 = vmatprep.subr.bf16.mxu0 %v1411_v28  ;;  %1442 = vmatpush3.bf16.msra.mxu1 %v1441_v32  ;;  %v1453_v1 = vpack.c.bf16 %v399_v0, %v398_v63  ;;  %v659_v15 = vrot.slane %v643_v12, %v642_v11  ;;  %v651_v16 = vcombine.high %v643_v12, %v643_v12 }
  0x21   :  { %1243 = vmatmul.mubr.msk.f32.gmra.mrb[10].mxu0 %vm69_vm0, %v28_v36  ;;  %1444 = vmatprep.subr.bf16.mxu1 %v1443_v40  ;;  %v652_v17 = vcombine.high %v650_v13, %v650_v13  ;;  %v666_v18 = vrot.slane %v650_v13, %v642_v11 }
  0x22   :  { %1251 = vmatmul.mubr.msk.f32.gmra.mrb[10].mxu1 %vm69_vm0, %v28_v36  ;;  %194 = vmatprep.mubr.f32.mxu0 %v1528_v3  ;;  %v688_v19 = vrot.slane %v659_v15, %v1873_v14  ;;  %v681_v20 = vcombine.high %v659_v15, %v659_v15  ;;  %v673_v21 = vrot.slane %v651_v16, %v642_v11 }
  0x23   :  { %307 = vmatprep.mubr.f32.mxu1 %v1528_v3  ;;  %1414 = vmatpush3.bf16.msra.mxu0 %v1413_v39  ;;  %v680_v22 = vrot.slane %v652_v17, %v642_v11  ;;  %v704_v23 = vrot.slane %v666_v18, %v1873_v14  ;;  %v682_v30 = vcombine.high %v666_v18, %v666_v18 }
  0x24   :  { %1416 = vmatprep.subr.bf16.mxu0 %v1415_v41  ;;  %1446 = vmatpush3.bf16.msra.mxu1 %v1445_v44  ;;  %vm1878_vm1 = vcmp.lt.s32.totalorder %v1869_v8, %v688_v19  ;;  %v696_v25 = vrot.slane %v681_v20, %v1873_v14  ;;  %v692_v26 = vrot.slane %v673_v21, %v1873_v14 }
  0x25   :  { %1244 = vmatmul.mubr.msk.f32.gmra.mrb[12].mxu0 %vm69_vm0, %v29_v47  ;;  %1448 = vmatprep.subr.bf16.mxu1 %v1447_v49  ;;  %v708_v27 = vrot.slane %v680_v22, %v1873_v14  ;;  %v725_v28 = vsel %vm1878_vm1, 1, %v1529_v4  ;;  %v683_v29 = vcombine.high %v673_v21, %v673_v21  ;;  %vm1906_vm5 = vcmp.lt.s32.totalorder %v1869_v8, %v704_v23 }
  0x26   :  { %1252 = vmatmul.mubr.msk.f32.gmra.mrb[12].mxu1 %vm69_vm0, %v29_v47  ;;  %200 = vmatprep.mubr.f32.mxu0 %v1528_v3  ;;  %vm719_vm2 = vcmp.lt.s32.totalorder %v1869_v8, %v696_v25  ;;  %vm1890_vm3 = vcmp.lt.s32.totalorder %v1869_v8, %v692_v26  ;;  %v712_v38 = vrot.slane %v682_v30, %v1873_v14  ;;  %v729_v40 = vsel %vm1906_vm5, 1, %v1529_v4 }
  0x27   :  { %313 = vmatprep.mubr.f32.mxu1 %v1528_v3  ;;  %1418 = vmatpush3.bf16.msra.mxu0 %v1417_v48  ;;  %vm1895_vm4 = vcmp.lt.s32.totalorder %v1869_v8, %v708_v27  ;;  %v727_v33 = vsel %vm719_vm2, 1, %v1529_v4  ;;  %v726_v34 = vsel %vm1890_vm3, 1, %v1529_v4  ;;  %v700_v36 = vrot.slane %v683_v29, %v1873_v14 }
  0x28   :  { %1450 = vmatpush3.bf16.msra.mxu1 %v1449_v53  ;;  %1420 = vmatprep.subr.bf16.mxu0 %v1419_v57  ;;  %v730_v37 = vsel %vm1895_vm4, 1, %v1529_v4  ;;  %v684_v39 = vcombine.high %v680_v22, %v680_v22  ;;  %vm723_vm7 = vcmp.lt.s32.totalorder %v1869_v8, %v712_v38  ;;  %v1255_v43 = vsel %vm1878_vm1, 1.0, %v1528_v3  ;;  %v47_v57 = vld [vmem:[%s2184_s3] sm:$0xf] }
  0x29   :  { %1245 = vmatmul.mubr.msk.f32.gmra.mrb[14].mxu0 %vm69_vm0, %v30_v50  ;;  %1452 = vmatprep.subr.bf16.mxu1 %v1451_v62  ;;  %vm720_vm6 = vcmp.lt.s32.totalorder %v1869_v8, %v700_v36  ;;  %v1256_v44 = vsel %vm1890_vm3, 1.0, %v1528_v3  ;;  %v731_v45 = vsel %vm723_vm7, 1, %v1529_v4  ;;  %v1257_v46 = vsel %vm719_vm2, 1.0, %v1528_v3 }
  0x2a   :  { %1253 = vmatmul.mubr.msk.f32.gmra.mrb[14].mxu1 %vm69_vm0, %v30_v50  ;;  %1460 = vset.pattern.permute.xlu0 %v1529_v4  ;;  %v716_v41 = vrot.slane %v684_v39, %v1873_v14  ;;  %v728_v42 = vsel %vm720_vm6, 1, %v1529_v4  ;;  %v1258_v47 = vsel %vm720_vm6, 1.0, %v1528_v3  ;;  %v1462_v49 = vpack.i.bf16 %v1256_v44, %v1255_v43 }
  0x2b   :  { %1422 = vmatpush3.bf16.msra.mxu0 %v1421_v61  ;;  %1461 = vset.pattern.permute.xlu1 %v1529_v4  ;;  %v1260_v50 = vsel %vm1895_vm4, 1.0, %v1528_v3  ;;  %v1259_v51 = vsel %vm1906_vm5, 1.0, %v1528_v3  ;;  %v1472_v52 = vpack.i.bf16 %v1258_v47, %v1257_v46  ;;  %v1261_v53 = vsel %vm723_vm7, 1.0, %v1528_v3 }
  0x2c   :  { %1454 = vmatpush3.bf16.msra.mxu1 %v1453_v1  ;;  %734 = vperm.xlu0 %1460, %v725_v28   ;;  %vm724_vm8 = vcmp.lt.s32.totalorder %v1869_v8, %v716_v41  ;;  %v1467_v55 = vpack.i.bf16 %v1260_v50, %v1259_v51  ;;  %v1954_v61 = vrot.slane %v47_v57, %v1873_v14  ;;  %vm1198_vm3 = vcmask 1041409  }
  0x2d   :  { %740 = vperm.xlu1 %1461, %v727_v33   ;;  %v732_v48 = vsel %vm724_vm8, 1, %v1529_v4  ;;  %v1262_v54 = vsel %vm724_vm8, 1.0, %v1528_v3  ;;  %v1956_v3 = vrot.slane %v47_v57, %v59_v58  ;;  %v1958_v62 = vrot.slane %v47_v57, %v55_v59 }
  0x2e   :  { %v1477_v56 = vpack.i.bf16 %v1262_v54, %v1261_v53  ;;  %v1960_v63 = vrot.slane %v47_v57, %v63_v60  ;;  %vm1200_vm4 = vcmask 1042434   ;;  %vm1202_vm5 = vcmask 1043459  }
  0x2f   :  { %vm1204_vm6 = vcmask 1044484   ;;  %vm1206_vm7 = vcmask 1045509   ;;  %vm1208_vm8 = vcmask 1046534  }
  0x30   :  { %737 = vperm.xlu0 %1460, %v726_v34  }
  0x31   :  { %749 = vperm.xlu1 %1461, %v730_v37  }
  0x34   :  { %746 = vperm.xlu0 %1460, %v729_v40  }
  0x35   :  { %743 = vperm.xlu1 %1461, %v728_v42  }
  0x38   :  { %752 = vperm.xlu0 %1460, %v731_v45  }
  0x39   :  { %755 = vperm.xlu1 %1461, %v732_v48  }
  0x3c   :  { %1463 = vperm.xlu0 %1460, %v1462_v49  }
  0x3d   :  { %1473 = vperm.xlu1 %1461, %v1472_v52  }
  0x40   :  { %1468 = vperm.xlu0 %1460, %v1467_v55  }
  0x41   :  { %1478 = vperm.xlu1 %1461, %v1477_v56  }
  0xe0   :  { %v160_v0 = vpop.f32.mrb[0].mxu0 }
  0xe1   :  { %v161_v1 = vadd.f32 %v160_v0, %v1954_v61  ;;  %v273_v2 = vpop.f32.mrb[0].mxu1  ;;  %v162_v5 = vpop.f32.mrb[1].mxu0 }
  0xe2   :  { %v274_v6 = vadd.f32 %v273_v2, %v1956_v3  ;;  %v163_v7 = vadd.f32 %v162_v5, %v1958_v62  ;;  %v275_v9 = vpop.f32.mrb[1].mxu1 }
  0xe3   :  { %v276_v8 = vadd.f32 %v275_v9, %v1960_v63  ;;  %v320_v13 = vmax.f32 %v161_v1, 0.0 }
  0xe4   :  { %v322_v10 = vmax.f32 %v274_v6, 0.0  ;;  %v321_v11 = vmax.f32 %v163_v7, 0.0  ;;  %v166_v12 = vpop.f32.mrb[2].mxu0 }
  0xe5   :  { %v323_v14 = vmax.f32 %v276_v8, 0.0  ;;  %v167_v15 = vadd.f32 %v166_v12, %v1954_v61  ;;  %v279_v16 = vpop.f32.mrb[2].mxu1  ;;  %v168_v17 = vpop.f32.mrb[3].mxu0 }
  0xe6   :  { %v280_v18 = vadd.f32 %v279_v16, %v1956_v3  ;;  %v169_v19 = vadd.f32 %v168_v17, %v1958_v62  ;;  %v281_v20 = vpop.f32.mrb[3].mxu1  ;;  %487 = vmatprep.mubr.f32.mxu0 %v321_v11 }
  0xe7   :  { %v282_v21 = vadd.f32 %v281_v20, %v1960_v63  ;;  %592 = vmatprep.mubr.f32.mxu1 %v323_v14  ;;  %488 = vmatmul.mubr.f32.vlgmr.msra.gmra.mrb[16].mxu0 %v320_v13  ;;  %v324_v25 = vmax.f32 %v167_v15, 0.0 }
  0xe8   :  { %v326_v22 = vmax.f32 %v280_v18, 0.0  ;;  %v325_v23 = vmax.f32 %v169_v19, 0.0  ;;  %593 = vmatmul.mubr.f32.vlgmr.msra.gmra.mrb[16].mxu1 %v322_v10  ;;  %v172_v24 = vpop.f32.mrb[4].mxu0 }
  0xe9   :  { %v327_v26 = vmax.f32 %v282_v21, 0.0  ;;  %v173_v27 = vadd.f32 %v172_v24, %v1954_v61  ;;  %v285_v28 = vpop.f32.mrb[4].mxu1  ;;  %v174_v29 = vpop.f32.mrb[5].mxu0 }
  0xea   :  { %v286_v30 = vadd.f32 %v285_v28, %v1956_v3  ;;  %v175_v31 = vadd.f32 %v174_v29, %v1958_v62  ;;  %v287_v32 = vpop.f32.mrb[5].mxu1  ;;  %492 = vmatprep.mubr.f32.mxu0 %v325_v23 }
  0xeb   :  { %v288_v33 = vadd.f32 %v287_v32, %v1960_v63  ;;  %597 = vmatprep.mubr.f32.mxu1 %v327_v26  ;;  %493 = vmatmul.mubr.f32.gmra.mrb[18].mxu0 %v324_v25  ;;  %v328_v37 = vmax.f32 %v173_v27, 0.0 }
  0xec   :  { %v330_v34 = vmax.f32 %v286_v30, 0.0  ;;  %v329_v35 = vmax.f32 %v175_v31, 0.0  ;;  %598 = vmatmul.mubr.f32.gmra.mrb[18].mxu1 %v326_v22  ;;  %v178_v36 = vpop.f32.mrb[6].mxu0 }
  0xed   :  { %v331_v38 = vmax.f32 %v288_v33, 0.0  ;;  %v179_v39 = vadd.f32 %v178_v36, %v1954_v61  ;;  %v291_v40 = vpop.f32.mrb[6].mxu1  ;;  %v180_v41 = vpop.f32.mrb[7].mxu0 }
  0xee   :  { %v292_v42 = vadd.f32 %v291_v40, %v1956_v3  ;;  %v181_v43 = vadd.f32 %v180_v41, %v1958_v62  ;;  %v293_v44 = vpop.f32.mrb[7].mxu1  ;;  %497 = vmatprep.mubr.f32.mxu0 %v329_v35  ;;  %v735_v40 = vpop.permute.xlu0 %734 }
  0xef   :  { %v294_v45 = vadd.f32 %v293_v44, %v1960_v63  ;;  %602 = vmatprep.mubr.f32.mxu1 %v331_v38  ;;  %498 = vmatmul.mubr.f32.gmra.mrb[20].mxu0 %v328_v37  ;;  %v332_v49 = vmax.f32 %v179_v39, 0.0  ;;  %v741_v44 = vpop.permute.xlu1 %740  ;;  %vm757_vm9 = vcmp.eq.s32.totalorder %v735_v40, 1 }
  0xf0   :  { %v334_v46 = vmax.f32 %v292_v42, 0.0  ;;  %v333_v47 = vmax.f32 %v181_v43, 0.0  ;;  %603 = vmatmul.mubr.f32.gmra.mrb[20].mxu1 %v330_v34  ;;  %v184_v48 = vpop.f32.mrb[8].mxu0  ;;  %vm759_vm12 = vcmp.eq.s32.totalorder %v741_v44, 1 }
  0xf1   :  { %v335_v50 = vmax.f32 %v294_v45, 0.0  ;;  %v185_v51 = vadd.f32 %v184_v48, %v1954_v61  ;;  %v297_v52 = vpop.f32.mrb[8].mxu1  ;;  %v186_v53 = vpop.f32.mrb[9].mxu0 }
  0xf2   :  { %v298_v54 = vadd.f32 %v297_v52, %v1956_v3  ;;  %v187_v55 = vadd.f32 %v186_v53, %v1958_v62  ;;  %v299_v56 = vpop.f32.mrb[9].mxu1  ;;  %502 = vmatprep.mubr.f32.mxu0 %v333_v47 }
  0xf3   :  { %v300_v57 = vadd.f32 %v299_v56, %v1960_v63  ;;  %607 = vmatprep.mubr.f32.mxu1 %v335_v50  ;;  %503 = vmatmul.mubr.f32.gmra.mrb[22].mxu0 %v332_v49  ;;  %v336_v0 = vmax.f32 %v185_v51, 0.0 }
  0xf4   :  { %v338_v58 = vmax.f32 %v298_v54, 0.0  ;;  %v337_v59 = vmax.f32 %v187_v55, 0.0  ;;  %608 = vmatmul.mubr.f32.gmra.mrb[22].mxu1 %v334_v46  ;;  %v190_v60 = vpop.f32.mrb[10].mxu0  ;;  %v738_v54 = vpop.permute.xlu0 %737 }
  0xf5   :  { %v339_v1 = vmax.f32 %v300_v57, 0.0  ;;  %v191_v2 = vadd.f32 %v190_v60, %v1954_v61  ;;  %v303_v5 = vpop.f32.mrb[10].mxu1  ;;  %v192_v6 = vpop.f32.mrb[11].mxu0  ;;  %vm758_vm11 = vcmp.eq.s32.totalorder %v738_v54, 1 }
  0xf6   :  { %v304_v7 = vadd.f32 %v303_v5, %v1956_v3  ;;  %v193_v9 = vadd.f32 %v192_v6, %v1958_v62  ;;  %v305_v8 = vpop.f32.mrb[11].mxu1  ;;  %507 = vmatprep.mubr.f32.mxu0 %v337_v59 }
  0xf7   :  { %v306_v10 = vadd.f32 %v305_v8, %v1960_v63  ;;  %612 = vmatprep.mubr.f32.mxu1 %v339_v1  ;;  %508 = vmatmul.mubr.f32.gmra.mrb[24].mxu0 %v336_v0  ;;  %v340_v14 = vmax.f32 %v191_v2, 0.0  ;;  %v2007_v0 = vpop.permute.xlu1 %749 }
  0xf8   :  { %v342_v11 = vmax.f32 %v304_v7, 0.0  ;;  %v341_v12 = vmax.f32 %v193_v9, 0.0  ;;  %613 = vmatmul.mubr.f32.gmra.mrb[24].mxu1 %v338_v58  ;;  %v196_v13 = vpop.f32.mrb[12].mxu0  ;;  %vm762_vm15 = vcmp.eq.s32.totalorder %v2007_v0, 1 }
  0xf9   :  { %v343_v15 = vmax.f32 %v306_v10, 0.0  ;;  %v197_v16 = vadd.f32 %v196_v13, %v1954_v61  ;;  %v309_v17 = vpop.f32.mrb[12].mxu1  ;;  %v198_v18 = vpop.f32.mrb[13].mxu0 }
  0xfa   :  { %v310_v19 = vadd.f32 %v309_v17, %v1956_v3  ;;  %v199_v20 = vadd.f32 %v198_v18, %v1958_v62  ;;  %v311_v21 = vpop.f32.mrb[13].mxu1  ;;  %512 = vmatprep.mubr.f32.mxu0 %v341_v12 }
  0xfb   :  { %v312_v22 = vadd.f32 %v311_v21, %v1960_v63  ;;  %617 = vmatprep.mubr.f32.mxu1 %v343_v15  ;;  %513 = vmatmul.mubr.f32.gmra.mrb[26].mxu0 %v340_v14  ;;  %v344_v26 = vmax.f32 %v197_v16, 0.0 }
  0xfc   :  { %v346_v23 = vmax.f32 %v310_v19, 0.0  ;;  %v345_v24 = vmax.f32 %v199_v20, 0.0  ;;  %618 = vmatmul.mubr.f32.gmra.mrb[26].mxu1 %v342_v11  ;;  %v202_v25 = vpop.f32.mrb[14].mxu0 }
  0xfd   :  { %v347_v27 = vmax.f32 %v312_v22, 0.0  ;;  %v203_v28 = vadd.f32 %v202_v25, %v1954_v61  ;;  %v315_v29 = vpop.f32.mrb[14].mxu1  ;;  %v204_v30 = vpop.f32.mrb[15].mxu0  ;;  %v1531_v61 = vmov 1  }
  0xfe   :  { %v316_v31 = vadd.f32 %v315_v29, %v1956_v3  ;;  %v205_v32 = vadd.f32 %v204_v30, %v1958_v62  ;;  %v317_v33 = vpop.f32.mrb[15].mxu1  ;;  %517 = vmatprep.mubr.f32.mxu0 %v345_v24  ;;  %1482 = vset.pattern.permute.xlu0 %v1531_v61  ;;  %v744_v22 = vpop.permute.xlu1 %743 }
  0xff   :  { %v318_v34 = vadd.f32 %v317_v33, %v1960_v63  ;;  %622 = vmatprep.mubr.f32.mxu1 %v347_v27  ;;  %518 = vmatmul.mubr.f32.gmra.mrb[28].mxu0 %v344_v26  ;;  %v348_v37 = vmax.f32 %v203_v28, 0.0  ;;  %v1999_v63 = vld [vmem:[%s2185_s5] ss:$0 sm:$0xff]  ;;  %vm760_vm13 = vcmp.eq.s32.totalorder %v744_v22, 1 }
 0x100   :  { %v350_v35 = vmax.f32 %v316_v31, 0.0  ;;  %v349_v36 = vmax.f32 %v205_v32, 0.0  ;;  %623 = vmatmul.mubr.f32.gmra.mrb[28].mxu1 %v346_v23  ;;  %1483 = vset.pattern.permute.xlu1 %v1531_v61 }
 0x101   :  { %v351_v38 = vmax.f32 %v318_v34, 0.0 }
 0x102   :  { %522 = vmatprep.mubr.f32.mxu0 %v349_v36 }
 0x103   :  { %627 = vmatprep.mubr.f32.mxu1 %v351_v38  ;;  %523 = vmatmul.mubr.f32.gmra.mrb[30].mxu0 %v348_v37 }
 0x104   :  { %628 = vmatmul.mubr.f32.gmra.mrb[30].mxu1 %v350_v35 }
 0x1ba   :  { %v1295_v3 = vpop.f32.mrb[16].mxu0 }
 0x1bb   :  { %v1351_v62 = vpop.f32.mrb[16].mxu1  ;;  %v1296_v39 = vpop.f32.mrb[17].mxu0 }
 0x1bc   :  { %v1297_v41 = vadd.f32 %v1296_v39, %v1295_v3  ;;  %v1352_v42 = vpop.f32.mrb[17].mxu1 }
 0x1bd   :  { %v1353_v43 = vadd.f32 %v1352_v42, %v1351_v62 }
 0x1be   :  { %v490_v45 = vadd.f32 %v1297_v41, %v1999_v63  ;;  %v1298_v46 = vpop.f32.mrb[18].mxu0 }
 0x1bf   :  { %v1354_v47 = vpop.f32.mrb[18].mxu1  ;;  %v1299_v48 = vpop.f32.mrb[19].mxu0 }
 0x1c0   :  { %v595_v49 = vadd.f32 %v1353_v43, %v490_v45  ;;  %v1300_v50 = vadd.f32 %v1299_v48, %v1298_v46  ;;  %v1355_v51 = vpop.f32.mrb[19].mxu1  ;;  %v747_v45 = vpop.permute.xlu0 %746 }
 0x1c1   :  { %v1356_v52 = vadd.f32 %v1355_v51, %v1354_v47  ;;  %vm761_vm14 = vcmp.eq.s32.totalorder %v747_v45, 1 }
 0x1c2   :  { %v2002_v53 = vsel %vm757_vm9, %v595_v49, -1e+30  ;;  %v495_v55 = vadd.f32 %v1300_v50, %v1999_v63  ;;  %v1301_v56 = vpop.f32.mrb[20].mxu0  ;;  %vm1210_vm9 = vcmask 1047559  }
 0x1c3   :  { %v774_v57 = vsel %vm773_vm10, %v2002_v53, -inf  ;;  %v1357_v58 = vpop.f32.mrb[20].mxu1  ;;  %v1302_v59 = vpop.f32.mrb[21].mxu0 }
 0x1c4   :  { %v775_v60 = vrot.slane %v774_v57, 4  ;;  %v600_v1 = vadd.f32 %v1356_v52, %v495_v55  ;;  %v1303_v2 = vadd.f32 %v1302_v59, %v1301_v56  ;;  %v1358_v5 = vpop.f32.mrb[21].mxu1 }
 0x1c5   :  { %v1359_v6 = vadd.f32 %v1358_v5, %v1357_v58 }
 0x1c6   :  { %v776_v7 = vmax.f32 %v774_v57, %v775_v60  ;;  %v2009_v9 = vsel %vm758_vm11, %v600_v1, -1e+30  ;;  %v500_v8 = vadd.f32 %v1303_v2, %v1999_v63  ;;  %v1304_v10 = vpop.f32.mrb[22].mxu0 }
 0x1c7   :  { %v781_v11 = vsel %vm773_vm10, %v2009_v9, -inf  ;;  %v1360_v12 = vpop.f32.mrb[22].mxu1  ;;  %v1305_v13 = vpop.f32.mrb[23].mxu0 }
 0x1c8   :  { %v777_v14 = vrot.slane %v776_v7, 2  ;;  %v782_v15 = vrot.slane %v781_v11, 4  ;;  %v605_v16 = vadd.f32 %v1359_v6, %v500_v8  ;;  %v1306_v17 = vadd.f32 %v1305_v13, %v1304_v10  ;;  %v1361_v18 = vpop.f32.mrb[23].mxu1 }
 0x1c9   :  { %v1362_v19 = vadd.f32 %v1361_v18, %v1360_v12 }
 0x1ca   :  { %v778_v20 = vmax.f32 %v776_v7, %v777_v14  ;;  %v783_v21 = vmax.f32 %v781_v11, %v782_v15  ;;  %v2014_v23 = vsel %vm759_vm12, %v605_v16, -1e+30  ;;  %v505_v24 = vadd.f32 %v1306_v17, %v1999_v63  ;;  %v1307_v25 = vpop.f32.mrb[24].mxu0  ;;  %v753_v14 = vpop.permute.xlu0 %752 }
 0x1cb   :  { %v788_v26 = vsel %vm773_vm10, %v2014_v23, -inf  ;;  %v1363_v27 = vpop.f32.mrb[24].mxu1  ;;  %v1308_v28 = vpop.f32.mrb[25].mxu0  ;;  %vm763_vm1 = vcmp.eq.s32.totalorder %v753_v14, 1 }
 0x1cc   :  { %v779_v29 = vrot.slane %v778_v20, 1  ;;  %v784_v30 = vrot.slane %v783_v21, 2  ;;  %v789_v31 = vrot.slane %v788_v26, 4  ;;  %v610_v32 = vadd.f32 %v1362_v19, %v505_v24  ;;  %v1364_v33 = vpop.f32.mrb[25].mxu1 }
 0x1cd   :  { %v1309_v34 = vadd.f32 %v1308_v28, %v1307_v25  ;;  %v1365_v35 = vadd.f32 %v1364_v33, %v1363_v27 }
 0x1ce   :  { %v780_v36 = vmax.f32 %v778_v20, %v779_v29  ;;  %v785_v37 = vmax.f32 %v783_v21, %v784_v30  ;;  %v790_v38 = vmax.f32 %v788_v26, %v789_v31  ;;  %v2019_v3 = vsel %vm760_vm13, %v610_v32, -1e+30  ;;  %v1310_v62 = vpop.f32.mrb[26].mxu0 }
 0x1cf   :  { %v795_v39 = vsel %vm773_vm10, %v2019_v3, -inf  ;;  %v510_v40 = vadd.f32 %v1309_v34, %v1999_v63  ;;  %v1366_v41 = vpop.f32.mrb[26].mxu1  ;;  %v1311_v42 = vpop.f32.mrb[27].mxu0 }
 0x1d0   :  { %v830_v43 = vsub.f32 %v2002_v53, %v780_v36  ;;  %v786_v44 = vrot.slane %v785_v37, 1  ;;  %v791_v46 = vrot.slane %v790_v38, 2  ;;  %v796_v47 = vrot.slane %v795_v39, 4  ;;  %v1367_v48 = vpop.f32.mrb[27].mxu1  ;;  %v1464_v36 = vpop.permute.xlu0 %1463 }
 0x1d1   :  { %v615_v49 = vadd.f32 %v1365_v35, %v510_v40  ;;  %v1312_v50 = vadd.f32 %v1311_v42, %v1310_v62  ;;  %v1368_v51 = vadd.f32 %v1367_v48, %v1366_v41  ;;  %v1465_v62 = vunpack.i.l.bf16 %v1464_v36 }
 0x1d2   :  { %v838_v52 = vmul.f32 1.442695, %v830_v43  ;;  %v787_v54 = vmax.f32 %v785_v37, %v786_v44  ;;  %v792_v55 = vmax.f32 %v790_v38, %v791_v46  ;;  %v797_v56 = vmax.f32 %v795_v39, %v796_v47  ;;  %v1313_v57 = vpop.f32.mrb[28].mxu0 }
 0x1d3   :  { %v2026_v58 = vsel %vm761_vm14, %v615_v49, -1e+30  ;;  %v515_v53 = vadd.f32 %v1312_v50, %v1999_v63  ;;  %v1369_v59 = vpop.f32.mrb[28].mxu1  ;;  %v1314_v60 = vpop.f32.mrb[29].mxu0  ;;  %v1466_v49 = vunpack.i.h.bf16 %v1464_v36 }
 0x1d4   :  { %1488 = vpow2.f32 %v838_v52  ;;  %v831_v1 = vsub.f32 %v2009_v9, %v787_v54  ;;  %v793_v2 = vrot.slane %v792_v55, 1  ;;  %v798_v5 = vrot.slane %v797_v56, 2  ;;  %v1370_v6 = vpop.f32.mrb[29].mxu1 }
 0x1d5   :  { %v802_v7 = vsel %vm773_vm10, %v2026_v58, -inf  ;;  %v620_v8 = vadd.f32 %v1368_v51, %v515_v53  ;;  %v1315_v10 = vadd.f32 %v1314_v60, %v1313_v57  ;;  %v1371_v11 = vadd.f32 %v1370_v6, %v1369_v59 }
 0x1d6   :  { %v840_v12 = vmul.f32 1.442695, %v831_v1  ;;  %v794_v13 = vmax.f32 %v792_v55, %v793_v2  ;;  %v799_v15 = vmax.f32 %v797_v56, %v798_v5  ;;  %v803_v16 = vrot.slane %v802_v7, 4  ;;  %v1316_v17 = vpop.f32.mrb[30].mxu0 }
 0x1d7   :  { %v2034_v18 = vsel %vm762_vm15, %v620_v8, -1e+30  ;;  %v520_v9 = vadd.f32 %v1315_v10, %v1999_v63  ;;  %v1372_v19 = vpop.f32.mrb[30].mxu1  ;;  %v1317_v20 = vpop.f32.mrb[31].mxu0 }
 0x1d8   :  { %1490 = vpow2.f32 %v840_v12  ;;  %v832_v21 = vsub.f32 %v2014_v23, %v794_v13  ;;  %v800_v22 = vrot.slane %v799_v15, 1  ;;  %v804_v24 = vmax.f32 %v802_v7, %v803_v16  ;;  %v1373_v25 = vpop.f32.mrb[31].mxu1  ;;  %v756_v23 = vpop.permute.xlu1 %755 }
 0x1d9   :  { %v809_v26 = vsel %vm773_vm10, %v2034_v18, -inf  ;;  %v625_v27 = vadd.f32 %v1371_v11, %v520_v9  ;;  %v1318_v28 = vadd.f32 %v1317_v20, %v1316_v17  ;;  %v1374_v29 = vadd.f32 %v1373_v25, %v1372_v19 }
 0x1da   :  { %v842_v30 = vmul.f32 1.442695, %v832_v21  ;;  %v801_v0 = vmax.f32 %v799_v15, %v800_v22  ;;  %v805_v31 = vrot.slane %v804_v24, 2  ;;  %v810_v32 = vrot.slane %v809_v26, 4 }
 0x1db   :  { %v2041_v33 = vsel %vm763_vm1, %v625_v27, -1e+30  ;;  %v525_v34 = vadd.f32 %v1318_v28, %v1999_v63  ;;  %vm764_vm2 = vcmp.eq.s32.totalorder %v756_v23, 1 }
 0x1dc   :  { %1492 = vpow2.f32 %v842_v30  ;;  %v833_v35 = vsub.f32 %v2019_v3, %v801_v0  ;;  %v806_v37 = vmax.f32 %v804_v24, %v805_v31  ;;  %v811_v38 = vmax.f32 %v809_v26, %v810_v32  ;;  %v1474_v1 = vpop.permute.xlu1 %1473 }
 0x1dd   :  { %v816_v39 = vsel %vm773_vm10, %v2041_v33, -inf  ;;  %v630_v40 = vadd.f32 %v1374_v29, %v525_v34  ;;  %v1475_v8 = vunpack.i.l.bf16 %v1474_v1  ;;  %v1476_v20 = vunpack.i.h.bf16 %v1474_v1  ;;  %v1469_v34 = vpop.permute.xlu0 %1468 }
 0x1de   :  { %v1489_v41 = vpop.eup %1488  ;;  %v844_v42 = vmul.f32 1.442695, %v833_v35  ;;  %v807_v43 = vrot.slane %v806_v37, 1  ;;  %v812_v44 = vrot.slane %v811_v38, 2  ;;  %v817_v45 = vrot.slane %v816_v39, 4 }
 0x1df   :  { %v2047_v46 = vmul.f32 %v1489_v41, %v1465_v62  ;;  %v2049_v63 = vsel %vm764_vm2, %v630_v40, -1e+30  ;;  %v1470_v40 = vunpack.i.l.bf16 %v1469_v34 }
 0x1e0   :  { %1494 = vpow2.f32 %v844_v42  ;;  %v808_v3 = vmax.f32 %v806_v37, %v807_v43  ;;  %v813_v47 = vmax.f32 %v811_v38, %v812_v44  ;;  %v818_v48 = vmax.f32 %v816_v39, %v817_v45 }
 0x1e1   :  { %v910_v50 = vsel %vm773_vm10, %v2047_v46, 0.0  ;;  %v823_v51 = vsel %vm773_vm10, %v2049_v63, -inf }
 0x1e2   :  { %v1491_v52 = vpop.eup %1490  ;;  %v911_v54 = vrot.slane %v910_v50, 4  ;;  %v834_v55 = vsub.f32 %v2026_v58, %v808_v3  ;;  %v814_v56 = vrot.slane %v813_v47, 1  ;;  %v819_v57 = vrot.slane %v818_v48, 2 }
 0x1e3   :  { %v2056_v53 = vmul.f32 %v1491_v52, %v1466_v49  ;;  %v824_v59 = vrot.slane %v823_v51, 4 }
 0x1e4   :  { %v912_v60 = vadd.f32 %v911_v54, %v910_v50  ;;  %v846_v2 = vmul.f32 1.442695, %v834_v55  ;;  %v815_v5 = vmax.f32 %v813_v47, %v814_v56  ;;  %v820_v6 = vmax.f32 %v818_v48, %v819_v57  ;;  %v1479_v56 = vpop.permute.xlu1 %1478 }
 0x1e5   :  { %v917_v7 = vsel %vm773_vm10, %v2056_v53, 0.0  ;;  %v825_v10 = vmax.f32 %v823_v51, %v824_v59  ;;  %v1471_v50 = vunpack.i.h.bf16 %v1469_v34 }
 0x1e6   :  { %v1493_v11 = vpop.eup %1492  ;;  %v918_v12 = vrot.slane %v917_v7, 4  ;;  %v913_v13 = vrot.slane %v912_v60, 2  ;;  %1496 = vpow2.f32 %v846_v2  ;;  %v835_v58 = vsub.f32 %v2034_v18, %v815_v5 }
 0x1e7   :  { %v2061_v14 = vmul.f32 %v1493_v11, %v1475_v8  ;;  %v821_v15 = vrot.slane %v820_v6, 1  ;;  %v826_v16 = vrot.slane %v825_v10, 2  ;;  %v1480_v2 = vunpack.i.l.bf16 %v1479_v56 }
 0x1e8   :  { %v919_v17 = vadd.f32 %v918_v12, %v917_v7  ;;  %v914_v9 = vadd.f32 %v913_v13, %v912_v60  ;;  %v848_v19 = vmul.f32 1.442695, %v835_v58 }
 0x1e9   :  { %v924_v21 = vsel %vm773_vm10, %v2061_v14, 0.0  ;;  %v822_v22 = vmax.f32 %v820_v6, %v821_v15  ;;  %v827_v24 = vmax.f32 %v825_v10, %v826_v16  ;;  %v1481_v16 = vunpack.i.h.bf16 %v1479_v56 }
 0x1ea   :  { %v1495_v25 = vpop.eup %1494  ;;  %v920_v26 = vrot.slane %v919_v17, 2  ;;  %v915_v27 = vrot.slane %v914_v9, 1  ;;  %v925_v28 = vrot.slane %v924_v21, 4  ;;  %1498 = vpow2.f32 %v848_v19 }
 0x1eb   :  { %v2065_v29 = vmul.f32 %v1495_v25, %v1476_v20  ;;  %v836_v18 = vsub.f32 %v2041_v33, %v822_v22  ;;  %v828_v30 = vrot.slane %v827_v24, 1 }
 0x1ec   :  { %v921_v0 = vadd.f32 %v920_v26, %v919_v17  ;;  %v916_v31 = vadd.f32 %v915_v27, %v914_v9  ;;  %v926_v32 = vadd.f32 %v925_v28, %v924_v21 }
 0x1ed   :  { %v931_v23 = vsel %vm773_vm10, %v2065_v29, 0.0  ;;  %v850_v35 = vmul.f32 1.442695, %v836_v18  ;;  %v829_v36 = vmax.f32 %v827_v24, %v828_v30 }
 0x1ee   :  { %v922_v37 = vrot.slane %v921_v0, 1  ;;  %v966_v38 = vmax.f32 %v916_v31, 1e-30  ;;  %v932_v62 = vrot.slane %v931_v23, 4  ;;  %v927_v39 = vrot.slane %v926_v32, 2 }
 0x1ef   :  { %1500 = vpow2.f32 %v850_v35  ;;  %v837_v41 = vsub.f32 %v2049_v63, %v829_v36 }
 0x1f0   :  { %v1497_v42 = vpop.eup %1496  ;;  %v923_v33 = vadd.f32 %v922_v37, %v921_v0  ;;  %1502 = vrcp.f32 %v966_v38  ;;  %v933_v43 = vadd.f32 %v932_v62, %v931_v23  ;;  %v928_v44 = vadd.f32 %v927_v39, %v926_v32 }
 0x1f1   :  { %v2071_v45 = vmul.f32 %v1497_v42, %v1470_v40  ;;  %v852_v3 = vmul.f32 1.442695, %v837_v41 }
 0x1f2   :  { %v967_v47 = vmax.f32 %v923_v33, 1e-30  ;;  %v934_v48 = vrot.slane %v933_v43, 2  ;;  %v929_v49 = vrot.slane %v928_v44, 1 }
 0x1f3   :  { %v938_v51 = vsel %vm773_vm10, %v2071_v45, 0.0  ;;  %1504 = vpow2.f32 %v852_v3 }
 0x1f4   :  { %v1499_v52 = vpop.eup %1498  ;;  %1506 = vrcp.f32 %v967_v47  ;;  %v935_v54 = vadd.f32 %v934_v48, %v933_v43  ;;  %v930_v63 = vadd.f32 %v929_v49, %v928_v44  ;;  %v939_v55 = vrot.slane %v938_v51, 4 }
 0x1f5   :  { %v2075_v57 = vmul.f32 %v1499_v52, %v1471_v50 }
 0x1f6   :  { %v936_v59 = vrot.slane %v935_v54, 1  ;;  %v968_v60 = vmax.f32 %v930_v63, 1e-30  ;;  %v940_v1 = vadd.f32 %v939_v55, %v938_v51  ;;  %v2093_v63 = vld [vmem:[%s2181_s1 + $0x8] sm:$0xff] }
 0x1f7   :  { %v945_v5 = vsel %vm773_vm10, %v2075_v57, 0.0 }
 0x1f8   :  { %v937_v6 = vadd.f32 %v936_v59, %v935_v54  ;;  %1508 = vrcp.f32 %v968_v60  ;;  %v941_v7 = vrot.slane %v940_v1, 2  ;;  %v946_v8 = vrot.slane %v945_v5, 4 }
 0x1f9   :  { %v1501_v10 = vpop.eup %1500 }
 0x1fa   :  { %v1503_v11 = vpop.eup %1502  ;;  %v969_v12 = vmax.f32 %v937_v6, 1e-30  ;;  %v942_v13 = vadd.f32 %v941_v7, %v940_v1  ;;  %v947_v58 = vadd.f32 %v946_v8, %v945_v5  ;;  %v908_v15 = vmul.f32 %v1501_v10, %v1480_v2  ;;  %v2114_v7 = vld [vmem:[%s2181_s1 + $0x18] sm:$0xff] }
 0x1fb   :  { %v982_v17 = vmul.f32 %v1503_v11, %v2047_v46 }
 0x1fc   :  { %1510 = vrcp.f32 %v969_v12  ;;  %v943_v9 = vrot.slane %v942_v13, 1  ;;  %v948_v19 = vrot.slane %v947_v58, 2  ;;  %v952_v20 = vsel %vm773_vm10, %v908_v15, 0.0 }
 0x1fd   :  { %v1505_v21 = vpop.eup %1504  ;;  %1095 = vperm.xlu0 %1482, %v982_v17   ;;  %v953_v22 = vrot.slane %v952_v20, 4 }
 0x1fe   :  { %v1507_v24 = vpop.eup %1506  ;;  %v944_v25 = vadd.f32 %v943_v9, %v942_v13  ;;  %v949_v26 = vadd.f32 %v948_v19, %v947_v58  ;;  %v909_v27 = vmul.f32 %v1505_v21, %v1481_v16  ;;  %v2121_v19 = vld [vmem:[%s2181_s1 + $0x20] sm:$0xff] }
 0x1ff   :  { %v983_v28 = vmul.f32 %v1507_v24, %v2056_v53  ;;  %v954_v18 = vadd.f32 %v953_v22, %v952_v20 }
 0x200   :  { %v970_v30 = vmax.f32 %v944_v25, 1e-30  ;;  %v950_v0 = vrot.slane %v949_v26, 1  ;;  %v959_v31 = vsel %vm773_vm10, %v909_v27, 0.0  ;;  %vm1232_vm10 = vcmask 523264  }
 0x201   :  { %1099 = vperm.xlu1 %1483, %v983_v28   ;;  %v955_v46 = vrot.slane %v954_v18, 2  ;;  %v960_v32 = vrot.slane %v959_v31, 4 }
 0x202   :  { %v1509_v34 = vpop.eup %1508  ;;  %1512 = vrcp.f32 %v970_v30  ;;  %v951_v23 = vadd.f32 %v950_v0, %v949_v26 }
 0x203   :  { %v984_v35 = vmul.f32 %v1509_v34, %v2061_v14  ;;  %v956_v36 = vadd.f32 %v955_v46, %v954_v18  ;;  %v961_v37 = vadd.f32 %v960_v32, %v959_v31  ;;  %v2128_v18 = vld [vmem:[%s2181_s1 + $0x28] sm:$0xff] }
 0x204   :  { %v971_v38 = vmax.f32 %v951_v23, 1e-30 }
 0x205   :  { %1103 = vperm.xlu1 %1483, %v984_v35   ;;  %v957_v62 = vrot.slane %v956_v36, 1  ;;  %v962_v39 = vrot.slane %v961_v37, 2 }
 0x206   :  { %v1511_v53 = vpop.eup %1510  ;;  %1514 = vrcp.f32 %v971_v38 }
 0x207   :  { %v985_v40 = vmul.f32 %v1511_v53, %v2065_v29  ;;  %v958_v41 = vadd.f32 %v957_v62, %v956_v36  ;;  %v963_v42 = vadd.f32 %v962_v39, %v961_v37  ;;  %v2135_v53 = vld [vmem:[%s2181_s1 + $0x30] sm:$0xff] }
 0x209   :  { %1107 = vperm.xlu0 %1482, %v985_v40   ;;  %v972_v33 = vmax.f32 %v958_v41, 1e-30  ;;  %v964_v43 = vrot.slane %v963_v42, 1 }
 0x20b   :  { %1516 = vrcp.f32 %v972_v33  ;;  %v965_v44 = vadd.f32 %v964_v43, %v963_v42 }
 0x20c   :  { %v1513_v3 = vpop.eup %1512 }
 0x20d   :  { %v986_v14 = vmul.f32 %v1513_v3, %v2071_v45  ;;  %v973_v47 = vmax.f32 %v965_v44, 1e-30 }
 0x20f   :  { %1111 = vperm.xlu1 %1483, %v986_v14   ;;  %1518 = vrcp.f32 %v973_v47 }
 0x210   :  { %v1515_v48 = vpop.eup %1514 }
 0x211   :  { %v987_v49 = vmul.f32 %v1515_v48, %v2075_v57 }
 0x213   :  { %1115 = vperm.xlu0 %1482, %v987_v49  }
 0x215   :  { %v1517_v50 = vpop.eup %1516 }
 0x216   :  { %v988_v51 = vmul.f32 %v1517_v50, %v908_v15  ;;  %v2142_v50 = vld [vmem:[%s2181_s1 + $0x38] sm:$0xff] }
 0x218   :  { %1119 = vperm.xlu1 %1483, %v988_v51  }
 0x219   :  { %v1519_v29 = vpop.eup %1518 }
 0x21a   :  { %v989_v52 = vmul.f32 %v1519_v29, %v909_v27 }
 0x21c   :  { %1123 = vperm.xlu0 %1482, %v989_v52   ;;  %1484 = vset.pattern.permute.xlu1 %v1529_v4 }
 0x21d   :  { %992 = vperm.xlu1 %1484, %v982_v17  }
 0x220   :  { %1485 = vset.pattern.permute.xlu0 %v1529_v4  ;;  %v2099_v4 = vld [vmem:[%s2181_s1] sm:$0xff] }
 0x221   :  { %997 = vperm.xlu0 %1485, %v983_v28   ;;  %1002 = vperm.xlu1 %1484, %v984_v35  }
 0x225   :  { %1012 = vperm.xlu0 %1485, %v986_v14   ;;  %1007 = vperm.xlu1 %1484, %v985_v40  }
 0x229   :  { %1022 = vperm.xlu0 %1485, %v988_v51   ;;  %1017 = vperm.xlu1 %1484, %v987_v49  }
 0x22d   :  { %1027 = vperm.xlu1 %1484, %v989_v52   ;;  %1486 = vset.pattern.permute.xlu0 %v1531_v61  ;;  %v2106_v61 = vld [vmem:[%s2181_s1 + $0x10] sm:$0xff]  ;;  %s1532_s1 = smov 32  }
 0x27c   :  { %v1096_v45 = vpop.permute.xlu0 %1095 }
 0x27d   :  { %v1126_v56 = vmul.f32 %v2099_v4, %v1096_v45 }
 0x27f   :  { %v1134_v1 = vsel %vm69_vm0, %v1126_v56, 0.0 }
 0x280   :  { %v1100_v54 = vpop.permute.xlu1 %1099  ;;  %v1135_v10 = vrot.slane %v1134_v1, 4 }
 0x281   :  { %v1127_v55 = vmul.f32 %v2093_v63, %v1100_v54 }
 0x282   :  { %v1136_v15 = vadd.f32 %v1135_v10, %v1134_v1 }
 0x283   :  { %v1141_v57 = vsel %vm69_vm0, %v1127_v55, 0.0 }
 0x284   :  { %v1104_v59 = vpop.permute.xlu1 %1103  ;;  %v1142_v2 = vrot.slane %v1141_v57, 4  ;;  %v1137_v24 = vrot.slane %v1136_v15, 2 }
 0x285   :  { %v1128_v60 = vmul.f32 %v2106_v61, %v1104_v59 }
 0x286   :  { %v1143_v12 = vadd.f32 %v1142_v2, %v1141_v57  ;;  %v1138_v32 = vadd.f32 %v1137_v24, %v1136_v15 }
 0x287   :  { %v1148_v5 = vsel %vm69_vm0, %v1128_v60, 0.0 }
 0x288   :  { %v1108_v6 = vpop.permute.xlu0 %1107  ;;  %v1149_v11 = vrot.slane %v1148_v5, 4  ;;  %v1144_v9 = vrot.slane %v1143_v12, 2  ;;  %v1139_v41 = vrot.slane %v1138_v32, 1 }
 0x289   :  { %v1129_v8 = vmul.f32 %v2114_v7, %v1108_v6 }
 0x28a   :  { %v1150_v16 = vadd.f32 %v1149_v11, %v1148_v5  ;;  %v1145_v28 = vadd.f32 %v1144_v9, %v1143_v12  ;;  %v1140_v54 = vadd.f32 %v1139_v41, %v1138_v32 }
 0x28b   :  { %v1155_v13 = vsel %vm69_vm0, %v1129_v8, 0.0 }
 0x28c   :  { %v1156_v58 = vrot.slane %v1155_v13, 4  ;;  %v1151_v25 = vrot.slane %v1150_v16, 2  ;;  %v1146_v36 = vrot.slane %v1145_v28, 1 }
 0x28e   :  { %v1112_v17 = vpop.permute.xlu1 %1111  ;;  %v1157_v21 = vadd.f32 %v1156_v58, %v1155_v13  ;;  %v1152_v34 = vadd.f32 %v1151_v25, %v1150_v16  ;;  %v1147_v44 = vadd.f32 %v1146_v36, %v1145_v28 }
 0x28f   :  { %v1130_v20 = vmul.f32 %v2121_v19, %v1112_v17 }
 0x290   :  { %v1158_v0 = vrot.slane %v1157_v21, 2  ;;  %v1153_v42 = vrot.slane %v1152_v34, 1  ;;  %v1221_v2 = vsel %vm1198_vm3, %v1147_v44, %v1140_v54 }
 0x291   :  { %v1162_v22 = vsel %vm69_vm0, %v1130_v20, 0.0 }
 0x292   :  { %v1163_v26 = vrot.slane %v1162_v22, 4  ;;  %v1116_v27 = vpop.permute.xlu0 %1115  ;;  %v1159_v38 = vadd.f32 %v1158_v0, %v1157_v21  ;;  %v1154_v55 = vadd.f32 %v1153_v42, %v1152_v34 }
 0x293   :  { %v1131_v30 = vmul.f32 %v2128_v18, %v1116_v27 }
 0x294   :  { %v1164_v31 = vadd.f32 %v1163_v26, %v1162_v22  ;;  %v1160_v47 = vrot.slane %v1159_v38, 1  ;;  %v1222_v15 = vsel %vm1200_vm4, %v1154_v55, %v1221_v2 }
 0x295   :  { %v1169_v46 = vsel %vm69_vm0, %v1131_v30, 0.0 }
 0x296   :  { %v1165_v23 = vrot.slane %v1164_v31, 2  ;;  %v1170_v35 = vrot.slane %v1169_v46, 4  ;;  %v1161_v5 = vadd.f32 %v1160_v47, %v1159_v38 }
 0x297   :  { %v1120_v37 = vpop.permute.xlu1 %1119 }
 0x298   :  { %v1166_v62 = vadd.f32 %v1165_v23, %v1164_v31  ;;  %v1171_v39 = vadd.f32 %v1170_v35, %v1169_v46  ;;  %v1132_v40 = vmul.f32 %v2135_v53, %v1120_v37 }
 0x29a   :  { %v1172_v33 = vrot.slane %v1171_v39, 2  ;;  %v1176_v43 = vsel %vm69_vm0, %v1132_v40, 0.0  ;;  %v1167_v48 = vrot.slane %v1166_v62, 1 }
 0x29b   :  { %v1177_v3 = vrot.slane %v1176_v43, 4  ;;  %v1124_v14 = vpop.permute.xlu0 %1123 }
 0x29c   :  { %v1173_v49 = vadd.f32 %v1172_v33, %v1171_v39  ;;  %v1133_v51 = vmul.f32 %v2142_v50, %v1124_v14  ;;  %v993_v29 = vpop.permute.xlu1 %992  ;;  %v1168_v6 = vadd.f32 %v1167_v48, %v1166_v62 }
 0x29d   :  { %v1178_v52 = vadd.f32 %v1177_v3, %v1176_v43  ;;  %v1030_v45 = vmul.f32 %v2099_v4, %v993_v29 }
 0x29e   :  { %v1174_v56 = vrot.slane %v1173_v49, 1  ;;  %v1183_v57 = vsel %vm69_vm0, %v1133_v51, 0.0 }
 0x29f   :  { %v1179_v59 = vrot.slane %v1178_v52, 2  ;;  %v1184_v60 = vrot.slane %v1183_v57, 4  ;;  %v1038_v1 = vsel %vm69_vm0, %v1030_v45, 0.0 }
 0x2a0   :  { %v1039_v8 = vrot.slane %v1038_v1, 4  ;;  %v998_v10 = vpop.permute.xlu0 %997  ;;  %v1003_v11 = vpop.permute.xlu1 %1002  ;;  %v1175_v16 = vadd.f32 %v1174_v56, %v1173_v49 }
 0x2a1   :  { %v1180_v4 = vadd.f32 %v1179_v59, %v1178_v52  ;;  %v1185_v12 = vadd.f32 %v1184_v60, %v1183_v57  ;;  %v1031_v13 = vmul.f32 %v2093_v63, %v998_v10  ;;  %v1032_v58 = vmul.f32 %v2106_v61, %v1003_v11 }
 0x2a2   :  { %v1040_v17 = vadd.f32 %v1039_v8, %v1038_v1  ;;  %v1223_v63 = vsel %vm1202_vm5, %v1161_v5, %v1222_v15 }
 0x2a3   :  { %v1181_v9 = vrot.slane %v1180_v4, 1  ;;  %v1186_v20 = vrot.slane %v1185_v12, 2  ;;  %v1045_v21 = vsel %vm69_vm0, %v1031_v13, 0.0  ;;  %v1052_v22 = vsel %vm69_vm0, %v1032_v58, 0.0 }
 0x2a4   :  { %v1041_v24 = vrot.slane %v1040_v17, 2  ;;  %v1046_v25 = vrot.slane %v1045_v21, 4  ;;  %v1053_v26 = vrot.slane %v1052_v22, 4  ;;  %v1013_v27 = vpop.permute.xlu0 %1012  ;;  %v1008_v28 = vpop.permute.xlu1 %1007  ;;  %v1224_v31 = vsel %vm1204_vm6, %v1168_v6, %v1223_v63 }
 0x2a5   :  { %v1187_v30 = vadd.f32 %v1186_v20, %v1185_v12  ;;  %v1034_v61 = vmul.f32 %v2121_v19, %v1013_v27  ;;  %v1033_v0 = vmul.f32 %v2114_v7, %v1008_v28  ;;  %v1182_v46 = vadd.f32 %v1181_v9, %v1180_v4 }
 0x2a6   :  { %v1042_v32 = vadd.f32 %v1041_v24, %v1040_v17  ;;  %v1047_v34 = vadd.f32 %v1046_v25, %v1045_v21  ;;  %v1054_v23 = vadd.f32 %v1053_v26, %v1052_v22  ;;  %v1225_v38 = vsel %vm1206_vm7, %v1175_v16, %v1224_v31 }
 0x2a7   :  { %v1188_v35 = vrot.slane %v1187_v30, 1  ;;  %v1066_v36 = vsel %vm69_vm0, %v1034_v61, 0.0  ;;  %v1059_v37 = vsel %vm69_vm0, %v1033_v0, 0.0  ;;  %v1226_v48 = vsel %vm1208_vm8, %v1182_v46, %v1225_v38 }
 0x2a8   :  { %v1043_v62 = vrot.slane %v1042_v32, 1  ;;  %v1048_v39 = vrot.slane %v1047_v34, 2  ;;  %v1055_v40 = vrot.slane %v1054_v23, 2  ;;  %v1067_v41 = vrot.slane %v1066_v36, 4  ;;  %v1023_v19 = vpop.permute.xlu0 %1022  ;;  %v1018_v42 = vpop.permute.xlu1 %1017 }
 0x2a9   :  { %v1060_v7 = vrot.slane %v1059_v37, 4  ;;  %v1036_v33 = vmul.f32 %v2135_v53, %v1023_v19  ;;  %v1035_v43 = vmul.f32 %v2128_v18, %v1018_v42  ;;  %v1189_v44 = vadd.f32 %v1188_v35, %v1187_v30 }
 0x2aa   :  { %v1049_v3 = vadd.f32 %v1048_v39, %v1047_v34  ;;  %v1056_v14 = vadd.f32 %v1055_v40, %v1054_v23  ;;  %v1068_v47 = vadd.f32 %v1067_v41, %v1066_v36  ;;  %v1044_v53 = vadd.f32 %v1043_v62, %v1042_v32 }
 0x2ab   :  { %v1061_v49 = vadd.f32 %v1060_v7, %v1059_v37  ;;  %v1080_v51 = vsel %vm69_vm0, %v1036_v33, 0.0  ;;  %v1073_v29 = vsel %vm69_vm0, %v1035_v43, 0.0  ;;  %v1227_v52 = vsel %vm1210_vm9, %v1189_v44, %v1226_v48 }
 0x2ac   :  { %v1050_v45 = vrot.slane %v1049_v3, 1  ;;  %v1057_v54 = vrot.slane %v1056_v14, 1  ;;  %v1069_v55 = vrot.slane %v1068_v47, 2  ;;  %v1081_v56 = vrot.slane %v1080_v51, 4  ;;  %1228 = vrot.lane.b32.xlu0 %v1227_v52, %s1532_s1  ;;  %v1028_v18 = vpop.permute.xlu1 %1027 }
 0x2ad   :  { %v1062_v57 = vrot.slane %v1061_v49, 2  ;;  %v1074_v59 = vrot.slane %v1073_v29, 4  ;;  %v1037_v60 = vmul.f32 %v2142_v50, %v1028_v18 }
 0x2ae   :  { %v1051_v1 = vadd.f32 %v1050_v45, %v1049_v3  ;;  %v1058_v2 = vadd.f32 %v1057_v54, %v1056_v14  ;;  %v1070_v5 = vadd.f32 %v1069_v55, %v1068_v47  ;;  %v1082_v6 = vadd.f32 %v1081_v56, %v1080_v51 }
 0x2af   :  { %v1063_v8 = vadd.f32 %v1062_v57, %v1061_v49  ;;  %v1075_v10 = vadd.f32 %v1074_v59, %v1073_v29  ;;  %v1087_v11 = vsel %vm69_vm0, %v1037_v60, 0.0 }
 0x2b0   :  { %v1199_v4 = vsel %vm1198_vm3, %v1051_v1, %v1044_v53  ;;  %v1071_v12 = vrot.slane %v1070_v5, 1  ;;  %v1083_v13 = vrot.slane %v1082_v6, 2  ;;  %v1088_v58 = vrot.slane %v1087_v11, 4 }
 0x2b1   :  { %v1201_v15 = vsel %vm1200_vm4, %v1058_v2, %v1199_v4  ;;  %v1064_v16 = vrot.slane %v1063_v8, 1  ;;  %v1076_v17 = vrot.slane %v1075_v10, 2 }
 0x2b2   :  { %v1072_v9 = vadd.f32 %v1071_v12, %v1070_v5  ;;  %v1084_v20 = vadd.f32 %v1083_v13, %v1082_v6  ;;  %v1089_v50 = vadd.f32 %v1088_v58, %v1087_v11 }
 0x2b3   :  { %v1065_v21 = vadd.f32 %v1064_v16, %v1063_v8  ;;  %v1077_v22 = vadd.f32 %v1076_v17, %v1075_v10 }
 0x2b4   :  { %v1085_v24 = vrot.slane %v1084_v20, 1  ;;  %v1090_v25 = vrot.slane %v1089_v50, 2 }
 0x2b5   :  { %v1203_v26 = vsel %vm1202_vm5, %v1065_v21, %v1201_v15  ;;  %v1078_v27 = vrot.slane %v1077_v22, 1 }
 0x2b6   :  { %v1086_v28 = vadd.f32 %v1085_v24, %v1084_v20  ;;  %v1091_v63 = vadd.f32 %v1090_v25, %v1089_v50  ;;  %v1205_v30 = vsel %vm1204_vm6, %v1072_v9, %v1203_v26 }
 0x2b7   :  { %v1079_v61 = vadd.f32 %v1078_v27, %v1077_v22 }
 0x2b8   :  { %v1092_v0 = vrot.slane %v1091_v63, 1 }
 0x2b9   :  { %v1207_v31 = vsel %vm1206_vm7, %v1079_v61, %v1205_v30 }
 0x2ba   :  { %v1093_v46 = vadd.f32 %v1092_v0, %v1091_v63  ;;  %v1209_v32 = vsel %vm1208_vm8, %v1086_v28, %v1207_v31 }
 0x2bc   :  { %v1211_v34 = vsel %vm1210_vm9, %v1093_v46, %v1209_v32 }
 0x31e   :  { %v1229_v23 = vpop.permute.xlu0 %1228 }
 0x31f   :  { %v1231_v35 = vsel %vm69_vm0, %v1211_v34, %v1229_v23 }
 0x320   :  { %1233 = vst.msk [vmem:[%s2186_s6] sm:$0xff] %vm1232_vm10, %v1231_v35 }

</bundles_post_ra>
